<compile_context>
chip_gen: v7x
topology: tpu7x:2x2x1
jax: 0.10.0
libtpu: 0.0.40
codegen_flags: <defaults>
</compile_context>

<pallas_src>
import functools

import jax
import jax.numpy as jnp
from jax.experimental import pallas as pl
from jax.experimental.pallas import tpu as pltpu


def _round_up(n, m):
    return ((n + m - 1) // m) * m


# ---------------------------------------------------------------------------
# Kernel: fused 4-layer tanh MLP (both feature nets at once) + sigmoid blend.
# Layout inside the kernel: batch on lanes.
#   x_ref : (F, TM)            input tile, F = layers[0]
#   wK    : (outK, inK)        fused weight for layer K (block-diagonal K>=1)
#   bK    : (outK, 1)          fused bias
#   o_ref : (out_dim, TM)      blended output tile (out_dim = layers[4])
# ---------------------------------------------------------------------------
def _fc_network_kernel(x_ref, w0, b0, w1, b1, w2, b2, w3, b3, o_ref):
    x = x_ref[...]                                              # (F, TM)

    h = jnp.tanh(jnp.dot(w0[...], x, preferred_element_type=jnp.float32) + b0[...])
    h = jnp.tanh(jnp.dot(w1[...], h, preferred_element_type=jnp.float32) + b1[...])
    h = jnp.tanh(jnp.dot(w2[...], h, preferred_element_type=jnp.float32) + b2[...])
    h = jnp.tanh(jnp.dot(w3[...], h, preferred_element_type=jnp.float32) + b3[...])
    # h: (2*out_dim, TM); rows [:out_dim] = feature1, rows [out_dim:] = feature2

    out_dim = o_ref.shape[0]
    x1 = h[:out_dim, :]
    x2 = h[out_dim:, :]

    # Lambda = 1/2 * (sigmoid(-(x[:,0]-38.75)) + sigmoid(-(x[:,2]-38.75)))
    # With batch on lanes these are full-lane row reads; sigmoid rides the EUP.
    c = jnp.float32(38.75)
    lam = 0.5 * (jax.nn.sigmoid(c - x[0:1, :]) + jax.nn.sigmoid(c - x[2:3, :]))

    # torch.matmul(Lambda.reshape(-1,1), [[1,1]]) == broadcast over the 2
    # output rows, so plain broadcasting is exact.
    o_ref[...] = x1 * lam + x2 * (1.0 - lam)


# ---------------------------------------------------------------------------
# One-time parameter packing (done outside the kernel / per model, not per call)
# params{1,2}: list of 4 (W, b) pairs in PyTorch layout: W (out, in), b (out,)
# ---------------------------------------------------------------------------
def pack_fc_params(params1, params2):
    def blkdiag(a, b):
        z_ab = jnp.zeros((a.shape[0], b.shape[1]), a.dtype)
        z_ba = jnp.zeros((b.shape[0], a.shape[1]), b.dtype)
        top = jnp.concatenate([a, z_ab], axis=1)
        bot = jnp.concatenate([z_ba, b], axis=1)
        return jnp.concatenate([top, bot], axis=0)

    (w10, b10), (w11, b11), (w12, b12), (w13, b13) = params1
    (w20, b20), (w21, b21), (w22, b22), (w23, b23) = params2

    W0 = jnp.concatenate([w10, w20], axis=0)          # (2H, F)
    B0 = jnp.concatenate([b10, b20], axis=0)[:, None]  # (2H, 1)
    W1 = blkdiag(w11, w21)                             # (2H, 2H)
    B1 = jnp.concatenate([b11, b21], axis=0)[:, None]
    W2 = blkdiag(w12, w22)                             # (2H, 2H)
    B2 = jnp.concatenate([b12, b22], axis=0)[:, None]
    W3 = blkdiag(w13, w23)                             # (2*out, 2H)
    B3 = jnp.concatenate([b13, b23], axis=0)[:, None]
    return (W0, B0, W1, B1, W2, B2, W3, B3)


# ---------------------------------------------------------------------------
# Wrapper: batch-tiled pallas_call with resident weights.
# x: (N, F) float32.  Returns (N, out_dim) float32.
# ---------------------------------------------------------------------------
def fc_network_forward(x, packed_params, *, block_batch=512):
    n, f = x.shape
    W0, B0, W1, B1, W2, B2, W3, B3 = packed_params
    out_dim = W3.shape[0] // 2

    # Pick a lane-aligned batch tile; pad the batch to a multiple of it.
    n_pad = _round_up(max(n, 1), 128)
    tm = _round_up(min(block_batch, n_pad), 128)
    n_pad = _round_up(n_pad, tm)

    # Transpose once in the wrapper: batch goes on the lane axis.
    xt = jnp.zeros((f, n_pad), jnp.float32).at[:, :n].set(x.T.astype(jnp.float32))

    grid = (n_pad // tm,)

    def resident(a):
        # Full-array block, constant index_map -> DMA'd once, VMEM-resident.
        return pl.BlockSpec(a.shape, lambda i: (0, 0))

    out_t = pl.pallas_call(
        _fc_network_kernel,
        out_shape=jax.ShapeDtypeStruct((out_dim, n_pad), jnp.float32),
        grid=grid,
        in_specs=[
            pl.BlockSpec((f, tm), lambda i: (0, i)),
            resident(W0), resident(B0),
            resident(W1), resident(B1),
            resident(W2), resident(B2),
            resident(W3), resident(B3),
        ],
        out_specs=pl.BlockSpec((out_dim, tm), lambda i: (0, i)),
        compiler_params=pltpu.CompilerParams(
            dimension_semantics=("parallel",)),
    )(xt, W0, B0, W1, B1, W2, B2, W3, B3)

    return out_t[:, :n].T


# ---------------------------------------------------------------------------
# Test harness
# ---------------------------------------------------------------------------
def _make_params(key, layers):
    """Xavier-normal weights (PyTorch layout W:(out,in)), zero biases."""
    params = []
    for i in range(4):
        fan_in, fan_out = layers[i], layers[i + 1]
        key, sub = jax.random.split(key)
        std = jnp.sqrt(2.0 / (fan_in + fan_out))
        w = std * jax.random.normal(sub, (fan_out, fan_in), dtype=jnp.float32)
        b = jnp.zeros((fan_out,), dtype=jnp.float32)
        params.append((w, b))
    return key, params


def _reference_forward(x, params1, params2):
    def mlp(h, ps):
        for w, b in ps:
            h = jnp.tanh(h @ w.T + b)
        return h
    x1 = mlp(x, params1)
    x2 = mlp(x, params2)
    lam = 0.5 * (jax.nn.sigmoid(-(x[:, 0:1] - 38.75))
                 + jax.nn.sigmoid(-(x[:, 2:3] - 38.75)))
    return x1 * lam + x2 * (1.0 - lam)


if __name__ == "__main__":
    # HJI_Vehicle value net: input = 5 states, hidden = 32, output = 2.
    layers = [5, 32, 32, 32, 2]

    key = jax.random.PRNGKey(0)
    key, params1 = _make_params(key, layers)
    key, params2 = _make_params(key, layers)
    packed = pack_fc_params(params1, params2)

    # Small deterministic batch (positions roughly 0..80 so the gate is non-trivial).
    key, sub = jax.random.split(key)
    batch = 8
    x = 40.0 * jax.random.uniform(sub, (batch, layers[0]), dtype=jnp.float32)

    out = fc_network_forward(x, packed)
    out = jax.block_until_ready(out)
    ref = _reference_forward(x, params1, params2)
    assert out.shape == (batch, layers[-1])
    assert jnp.allclose(out, ref, atol=1e-5, rtol=1e-5), "mismatch vs reference"

    # Second check: non-multiple batch with a multi-step (grid > 1) pipeline.
    key, sub = jax.random.split(key)
    batch2 = 272
    x2 = 40.0 * jax.random.uniform(sub, (batch2, layers[0]), dtype=jnp.float32)
    out2 = jax.block_until_ready(fc_network_forward(x2, packed, block_batch=128))
    ref2 = _reference_forward(x2, params1, params2)
    assert out2.shape == (batch2, layers[-1])
    assert jnp.allclose(out2, ref2, atol=1e-5, rtol=1e-5), "mismatch vs reference (grid>1)"

    print("KERNEL_OK")
</pallas_src>

<mosaic_0001>
module attributes {stable_mosaic.version = 11 : i64} {
  func.func @_fc_network_kernel(%arg0: i32, %arg1: memref<5x128xf32, #tpu.memory_space<vmem>>, %arg2: memref<64x5xf32, #tpu.memory_space<vmem>>, %arg3: memref<64x1xf32, #tpu.memory_space<vmem>>, %arg4: memref<64x64xf32, #tpu.memory_space<vmem>>, %arg5: memref<64x1xf32, #tpu.memory_space<vmem>>, %arg6: memref<64x64xf32, #tpu.memory_space<vmem>>, %arg7: memref<64x1xf32, #tpu.memory_space<vmem>>, %arg8: memref<4x64xf32, #tpu.memory_space<vmem>>, %arg9: memref<4x1xf32, #tpu.memory_space<vmem>>, %arg10: memref<2x128xf32, #tpu.memory_space<vmem>>) attributes {dimension_semantics = [#tpu.dimension_semantics<parallel>], iteration_bounds = array<i64: 1>, scalar_prefetch = 0 : i64, scratch_operands = 0 : i64, tpu.core_type = #tpu.core_type<tc>, window_params = [{transform_indices = @transform_0, window_bounds = array<i64: 5, 128>}, {pipeline_mode = #tpu.pipeline_mode<synchronous>, transform_indices = @transform_1, window_bounds = array<i64: 64, 5>}, {pipeline_mode = #tpu.pipeline_mode<synchronous>, transform_indices = @transform_2, window_bounds = array<i64: 64, 1>}, {pipeline_mode = #tpu.pipeline_mode<synchronous>, transform_indices = @transform_3, window_bounds = array<i64: 64, 64>}, {pipeline_mode = #tpu.pipeline_mode<synchronous>, transform_indices = @transform_4, window_bounds = array<i64: 64, 1>}, {pipeline_mode = #tpu.pipeline_mode<synchronous>, transform_indices = @transform_5, window_bounds = array<i64: 64, 64>}, {pipeline_mode = #tpu.pipeline_mode<synchronous>, transform_indices = @transform_6, window_bounds = array<i64: 64, 1>}, {pipeline_mode = #tpu.pipeline_mode<synchronous>, transform_indices = @transform_7, window_bounds = array<i64: 4, 64>}, {pipeline_mode = #tpu.pipeline_mode<synchronous>, transform_indices = @transform_8, window_bounds = array<i64: 4, 1>}, {transform_indices = @transform_9, window_bounds = array<i64: 2, 128>}]} {
    %c0 = arith.constant 0 : index
    %c0_0 = arith.constant 0 : index
    %0 = vector.load %arg1[%c0, %c0_0] : memref<5x128xf32, #tpu.memory_space<vmem>>, vector<5x128xf32>
    %c0_1 = arith.constant 0 : index
    %c0_2 = arith.constant 0 : index
    %1 = vector.load %arg2[%c0_1, %c0_2] : memref<64x5xf32, #tpu.memory_space<vmem>>, vector<64x5xf32>
    %cst = arith.constant dense<0.000000e+00> : vector<64x128xf32>
    %2 = tpu.matmul %1, %0, %cst {dimension_numbers = #tpu.dot_dimension_numbers<[1], [0], [0], [1], [0, 0, 1, 1], [], []>} : vector<64x5xf32>, vector<5x128xf32>, vector<64x128xf32> -> vector<64x128xf32>
    %c0_3 = arith.constant 0 : index
    %c0_4 = arith.constant 0 : index
    %3 = vector.load %arg3[%c0_3, %c0_4] : memref<64x1xf32, #tpu.memory_space<vmem>>, vector<64x1xf32>
    %4 = vector.broadcast %3 : vector<64x1xf32> to vector<64x128xf32>
    %5 = arith.addf %2, %4 : vector<64x128xf32>
    %6 = math.tanh %5 : vector<64x128xf32>
    %c0_5 = arith.constant 0 : index
    %c0_6 = arith.constant 0 : index
    %7 = vector.load %arg4[%c0_5, %c0_6] : memref<64x64xf32, #tpu.memory_space<vmem>>, vector<64x64xf32>
    %cst_7 = arith.constant dense<0.000000e+00> : vector<64x128xf32>
    %8 = tpu.matmul %7, %6, %cst_7 {dimension_numbers = #tpu.dot_dimension_numbers<[1], [0], [0], [1], [0, 0, 1, 1], [], []>} : vector<64x64xf32>, vector<64x128xf32>, vector<64x128xf32> -> vector<64x128xf32>
    %c0_8 = arith.constant 0 : index
    %c0_9 = arith.constant 0 : index
    %9 = vector.load %arg5[%c0_8, %c0_9] : memref<64x1xf32, #tpu.memory_space<vmem>>, vector<64x1xf32>
    %10 = vector.broadcast %9 : vector<64x1xf32> to vector<64x128xf32>
    %11 = arith.addf %8, %10 : vector<64x128xf32>
    %12 = math.tanh %11 : vector<64x128xf32>
    %c0_10 = arith.constant 0 : index
    %c0_11 = arith.constant 0 : index
    %13 = vector.load %arg6[%c0_10, %c0_11] : memref<64x64xf32, #tpu.memory_space<vmem>>, vector<64x64xf32>
    %cst_12 = arith.constant dense<0.000000e+00> : vector<64x128xf32>
    %14 = tpu.matmul %13, %12, %cst_12 {dimension_numbers = #tpu.dot_dimension_numbers<[1], [0], [0], [1], [0, 0, 1, 1], [], []>} : vector<64x64xf32>, vector<64x128xf32>, vector<64x128xf32> -> vector<64x128xf32>
    %c0_13 = arith.constant 0 : index
    %c0_14 = arith.constant 0 : index
    %15 = vector.load %arg7[%c0_13, %c0_14] : memref<64x1xf32, #tpu.memory_space<vmem>>, vector<64x1xf32>
    %16 = vector.broadcast %15 : vector<64x1xf32> to vector<64x128xf32>
    %17 = arith.addf %14, %16 : vector<64x128xf32>
    %18 = math.tanh %17 : vector<64x128xf32>
    %c0_15 = arith.constant 0 : index
    %c0_16 = arith.constant 0 : index
    %19 = vector.load %arg8[%c0_15, %c0_16] : memref<4x64xf32, #tpu.memory_space<vmem>>, vector<4x64xf32>
    %cst_17 = arith.constant dense<0.000000e+00> : vector<4x128xf32>
    %20 = tpu.matmul %19, %18, %cst_17 {dimension_numbers = #tpu.dot_dimension_numbers<[1], [0], [0], [1], [0, 0, 1, 1], [], []>} : vector<4x64xf32>, vector<64x128xf32>, vector<4x128xf32> -> vector<4x128xf32>
    %c0_18 = arith.constant 0 : index
    %c0_19 = arith.constant 0 : index
    %21 = vector.load %arg9[%c0_18, %c0_19] : memref<4x1xf32, #tpu.memory_space<vmem>>, vector<4x1xf32>
    %22 = vector.broadcast %21 : vector<4x1xf32> to vector<4x128xf32>
    %23 = arith.addf %20, %22 : vector<4x128xf32>
    %24 = math.tanh %23 : vector<4x128xf32>
    %25 = vector.extract_strided_slice %24 {offsets = [0, 0], sizes = [2, 128], strides = [1, 1]} : vector<4x128xf32> to vector<2x128xf32>
    %26 = vector.extract_strided_slice %24 {offsets = [2, 0], sizes = [2, 128], strides = [1, 1]} : vector<4x128xf32> to vector<2x128xf32>
    %27 = vector.extract_strided_slice %0 {offsets = [0, 0], sizes = [1, 128], strides = [1, 1]} : vector<5x128xf32> to vector<1x128xf32>
    %cst_20 = arith.constant 3.875000e+01 : f32
    %28 = vector.broadcast %cst_20 : f32 to vector<1x128xf32>
    %29 = arith.subf %28, %27 : vector<1x128xf32>
    %30 = arith.negf %29 : vector<1x128xf32>
    %31 = math.exp %30 : vector<1x128xf32>
    %cst_21 = arith.constant 1.000000e+00 : f32
    %32 = vector.broadcast %cst_21 : f32 to vector<1x128xf32>
    %33 = arith.addf %32, %31 : vector<1x128xf32>
    %34 = arith.divf %32, %33 : vector<1x128xf32>
    %35 = vector.extract_strided_slice %0 {offsets = [2, 0], sizes = [1, 128], strides = [1, 1]} : vector<5x128xf32> to vector<1x128xf32>
    %cst_22 = arith.constant 3.875000e+01 : f32
    %36 = vector.broadcast %cst_22 : f32 to vector<1x128xf32>
    %37 = arith.subf %36, %35 : vector<1x128xf32>
    %38 = arith.negf %37 : vector<1x128xf32>
    %39 = math.exp %38 : vector<1x128xf32>
    %cst_23 = arith.constant 1.000000e+00 : f32
    %40 = vector.broadcast %cst_23 : f32 to vector<1x128xf32>
    %41 = arith.addf %40, %39 : vector<1x128xf32>
    %42 = arith.divf %40, %41 : vector<1x128xf32>
    %43 = arith.addf %34, %42 : vector<1x128xf32>
    %cst_24 = arith.constant 5.000000e-01 : f32
    %44 = vector.broadcast %cst_24 : f32 to vector<1x128xf32>
    %45 = arith.mulf %44, %43 : vector<1x128xf32>
    %46 = vector.broadcast %45 : vector<1x128xf32> to vector<2x128xf32>
    %47 = arith.mulf %25, %46 : vector<2x128xf32>
    %cst_25 = arith.constant 1.000000e+00 : f32
    %48 = vector.broadcast %cst_25 : f32 to vector<1x128xf32>
    %49 = arith.subf %48, %45 : vector<1x128xf32>
    %50 = vector.broadcast %49 : vector<1x128xf32> to vector<2x128xf32>
    %51 = arith.mulf %26, %50 : vector<2x128xf32>
    %52 = arith.addf %47, %51 : vector<2x128xf32>
    %c0_26 = arith.constant 0 : index
    %c0_27 = arith.constant 0 : index
    %53 = vector.load %arg10[%c0_26, %c0_27] : memref<2x128xf32, #tpu.memory_space<vmem>>, vector<2x128xf32>
    tpu.vector_store %arg10[%c0_26, %c0_27], %52 {strides = array<i32>} : memref<2x128xf32, #tpu.memory_space<vmem>>, vector<2x128xf32>,
    return
  }
  func.func @transform_0(%arg0: i32) -> (i32, i32) {
    %c0_i32 = arith.constant 0 : i32
    %c0_i32_0 = arith.constant 0 : i32
    return %c0_i32, %arg0 : i32, i32
  }
  func.func @transform_1(%arg0: i32) -> (i32, i32) {
    %c0_i32 = arith.constant 0 : i32
    %c0_i32_0 = arith.constant 0 : i32
    %c0_i32_1 = arith.constant 0 : i32
    return %c0_i32, %c0_i32_0 : i32, i32
  }
  func.func @transform_2(%arg0: i32) -> (i32, i32) {
    %c0_i32 = arith.constant 0 : i32
    %c0_i32_0 = arith.constant 0 : i32
    %c0_i32_1 = arith.constant 0 : i32
    return %c0_i32, %c0_i32_0 : i32, i32
  }
  func.func @transform_3(%arg0: i32) -> (i32, i32) {
    %c0_i32 = arith.constant 0 : i32
    %c0_i32_0 = arith.constant 0 : i32
    %c0_i32_1 = arith.constant 0 : i32
    return %c0_i32, %c0_i32_0 : i32, i32
  }
  func.func @transform_4(%arg0: i32) -> (i32, i32) {
    %c0_i32 = arith.constant 0 : i32
    %c0_i32_0 = arith.constant 0 : i32
    %c0_i32_1 = arith.constant 0 : i32
    return %c0_i32, %c0_i32_0 : i32, i32
  }
  func.func @transform_5(%arg0: i32) -> (i32, i32) {
    %c0_i32 = arith.constant 0 : i32
    %c0_i32_0 = arith.constant 0 : i32
    %c0_i32_1 = arith.constant 0 : i32
    return %c0_i32, %c0_i32_0 : i32, i32
  }
  func.func @transform_6(%arg0: i32) -> (i32, i32) {
    %c0_i32 = arith.constant 0 : i32
    %c0_i32_0 = arith.constant 0 : i32
    %c0_i32_1 = arith.constant 0 : i32
    return %c0_i32, %c0_i32_0 : i32, i32
  }
  func.func @transform_7(%arg0: i32) -> (i32, i32) {
    %c0_i32 = arith.constant 0 : i32
    %c0_i32_0 = arith.constant 0 : i32
    %c0_i32_1 = arith.constant 0 : i32
    return %c0_i32, %c0_i32_0 : i32, i32
  }
  func.func @transform_8(%arg0: i32) -> (i32, i32) {
    %c0_i32 = arith.constant 0 : i32
    %c0_i32_0 = arith.constant 0 : i32
    %c0_i32_1 = arith.constant 0 : i32
    return %c0_i32, %c0_i32_0 : i32, i32
  }
  func.func @transform_9(%arg0: i32) -> (i32, i32) {
    %c0_i32 = arith.constant 0 : i32
    %c0_i32_0 = arith.constant 0 : i32
    return %c0_i32, %arg0 : i32, i32
  }
}

</mosaic_0001>

<bundles_post_ra>
// kernel: tpu_custom_call.1
= control target key start
LH: loop header
LB: loop body
LE: loop exit
PB: predicated region body
PF: predicated region fallthrough
CT: control target
= control target key end

     0   :  { %vm115_vm0 = vcmask 1044480   ;;  %vm90_vm1 = vcmask 39936   ;;  %v1037_v4 = vmov 0   ;;  %s1287_s0 = inlined_call_operand.vmem [shape: f32[5,128], index: 0, kind: input, shape index: {}]   ;;  %s1288_s1 = inlined_call_operand.vmem [shape: f32[64,5], index: 1, kind: input, shape index: {}]   ;;  %s1289_s2 = inlined_call_operand.vmem [shape: f32[64,1], index: 2, kind: input, shape index: {}]   ;;  %s1290_s3 = inlined_call_operand.vmem [shape: f32[64,64], index: 3, kind: input, shape index: {}]   ;;  %s1291_s4 = inlined_call_operand.vmem [shape: f32[64,1], index: 4, kind: input, shape index: {}]   ;;  %s1292_s5 = inlined_call_operand.vmem [shape: f32[64,64], index: 5, kind: input, shape index: {}]   ;;  %s1293_s6 = inlined_call_operand.vmem [shape: f32[64,1], index: 6, kind: input, shape index: {}]   ;;  %s1294_s7 = inlined_call_operand.vmem [shape: f32[4,64], index: 7, kind: input, shape index: {}]   ;;  %s1295_s8 = inlined_call_operand.vmem [shape: f32[4,1], index: 8, kind: input, shape index: {}]   ;;  %s1296_s9 = inlined_call_operand.hbm [shape: f32[2,128], index: 9, kind: output, shape index: {}]  }
   0x1   :  { %v1095_v0 = vld [vmem:[%s1287_s0] sm:$0x1f]  ;;  %v35_v2 = vld [vmem:[%s1288_s1 + $0x8] sm:$0xff]  ;;  %v36_v3 = vld [vmem:[%s1288_s1 + $0x10] sm:$0xff]  ;;  %957 = vset.pattern.permute.xlu0 %v1037_v4  ;;  %958 = vset.pattern.permute.xlu1 %v1037_v4 }
   0x2   :  { %v34_v1 = vld [vmem:[%s1288_s1] sm:$0xff]  ;;  %819 = vmatprep.subr.msk.mxu0 %vm115_vm0, %v1095_v0  ;;  %v44_v6 = vld [vmem:[%s1289_s2 + $0x10] sm:$0xff]  ;;  %v37_v7 = vld [vmem:[%s1288_s1 + $0x18] sm:$0xff] }
   0x3   :  { %821 = vmatprep.mubr.msk.f32.mxu0 %vm90_vm1, %v34_v1  ;;  %820 = vmatpush3.msk.msra.mxu0 %vm115_vm0, %v1095_v0  ;;  %v42_v5 = vld [vmem:[%s1289_s2] sm:$0xff]  ;;  %v43_v9 = vld [vmem:[%s1289_s2 + $0x8] sm:$0xff]  ;;  %v45_v10 = vld [vmem:[%s1289_s2 + $0x18] sm:$0xff] }
   0x4   :  { %822 = vmatmul.mubr.msk.f32.vlgmr.msra.gmra.mrb[0].mxu0 %vm90_vm1, %v35_v2  ;;  %52 = vperm.xlu0 %957, %v42_v5   ;;  %v38_v8 = vld [vmem:[%s1288_s1 + $0x20] sm:$0xff]  ;;  %v39_v11 = vld [vmem:[%s1288_s1 + $0x28] sm:$0xff]  ;;  %v40_v12 = vld [vmem:[%s1288_s1 + $0x30] sm:$0xff] }
   0x5   :  { %824 = vmatprep.mubr.msk.f32.mxu0 %vm90_vm1, %v36_v3  ;;  %62 = vperm.xlu1 %958, %v44_v6   ;;  %v46_v13 = vld [vmem:[%s1289_s2 + $0x20] sm:$0xff]  ;;  %v47_v14 = vld [vmem:[%s1289_s2 + $0x28] sm:$0xff] }
   0x8   :  { %825 = vmatmul.mubr.msk.f32.gmra.mrb[2].mxu0 %vm90_vm1, %v37_v7  ;;  %57 = vperm.xlu0 %957, %v43_v9  }
   0x9   :  { %827 = vmatprep.mubr.msk.f32.mxu0 %vm90_vm1, %v38_v8  ;;  %67 = vperm.xlu1 %958, %v45_v10  }
   0xc   :  { %828 = vmatmul.mubr.msk.f32.gmra.mrb[4].mxu0 %vm90_vm1, %v39_v11 }
   0xd   :  { %14 = vsyncpa [#allocation3], 0  ;;  %830 = vmatprep.mubr.msk.f32.mxu0 %vm90_vm1, %v40_v12  ;;  %v41_v15 = vld [vmem:[%s1288_s1 + $0x38] sm:$0xff]  ;;  %72 = vperm.xlu0 %957, %v46_v13   ;;  %v48_v16 = vld [vmem:[%s1289_s2 + $0x30] sm:$0xff]  ;;  %vm288_vm2 = vcmask 523264   ;;  %vm1039_vm3 = vmmov 0  }
   0xe   :  { %77 = vperm.xlu1 %958, %v47_v14   ;;  %v49_v17 = vld [vmem:[%s1289_s2 + $0x38] sm:$0xff]  ;;  %v240_v18 = vld [vmem:[%s1291_s4] sm:$0xff]  ;;  %v241_v19 = vld [vmem:[%s1291_s4 + $0x8] sm:$0xff] }
   0xf   :  { %v242_v20 = vld [vmem:[%s1291_s4 + $0x10] sm:$0xff]  ;;  %v243_v21 = vld [vmem:[%s1291_s4 + $0x18] sm:$0xff]  ;;  %v244_v22 = vld [vmem:[%s1291_s4 + $0x20] sm:$0xff] }
  0x10   :  { %831 = vmatmul.mubr.msk.f32.gmra.mrb[6].mxu0 %vm90_vm1, %v41_v15  ;;  %v245_v23 = vld [vmem:[%s1291_s4 + $0x28] sm:$0xff]  ;;  %v246_v24 = vld [vmem:[%s1291_s4 + $0x30] sm:$0xff]  ;;  %v247_v25 = vld [vmem:[%s1291_s4 + $0x38] sm:$0xff] }
  0x11   :  { %82 = vperm.xlu0 %957, %v48_v16   ;;  %v434_v26 = vld [vmem:[%s1293_s6] sm:$0xff]  ;;  %v435_v27 = vld [vmem:[%s1293_s6 + $0x8] sm:$0xff]  ;;  %v436_v28 = vld [vmem:[%s1293_s6 + $0x10] sm:$0xff] }
  0x12   :  { %87 = vperm.xlu1 %958, %v49_v17   ;;  %v437_v29 = vld [vmem:[%s1293_s6 + $0x18] sm:$0xff]  ;;  %v438_v30 = vld [vmem:[%s1293_s6 + $0x20] sm:$0xff]  ;;  %v439_v31 = vld [vmem:[%s1293_s6 + $0x28] sm:$0xff] }
  0x13   :  { %v440_v32 = vld [vmem:[%s1293_s6 + $0x30] sm:$0xff]  ;;  %v441_v33 = vld [vmem:[%s1293_s6 + $0x38] sm:$0xff]  ;;  %v620_v34 = vld [vmem:[%s1295_s8] sm:$0xf] }
  0x14   :  { %v232_v35 = vld [vmem:[%s1290_s3] sm:$0xff]  ;;  %v233_v9 = vld [vmem:[%s1290_s3 + $0x8] sm:$0xff]  ;;  %v234_v10 = vld [vmem:[%s1290_s3 + $0x10] sm:$0xff] }
  0x15   :  { %250 = vperm.xlu0 %957, %v240_v18   ;;  %849 = vmatprep.mubr.msk.f32.mxu1 %vm288_vm2, %v232_v35  ;;  %v235_v11 = vld [vmem:[%s1290_s3 + $0x18] sm:$0xff]  ;;  %v236_v12 = vld [vmem:[%s1290_s3 + $0x20] sm:$0xff]  ;;  %v237_v13 = vld [vmem:[%s1290_s3 + $0x28] sm:$0xff] }
  0x16   :  { %255 = vperm.xlu1 %958, %v241_v19   ;;  %v238_v14 = vld [vmem:[%s1290_s3 + $0x30] sm:$0xff]  ;;  %v239_v15 = vld [vmem:[%s1290_s3 + $0x38] sm:$0xff]  ;;  %v426_v16 = vld [vmem:[%s1292_s5] sm:$0xff] }
  0x17   :  { %877 = vmatprep.mubr.msk.f32.mxu0 %vm288_vm2, %v426_v16 }
  0x19   :  { %260 = vperm.xlu0 %957, %v242_v20  }
  0x1a   :  { %265 = vperm.xlu1 %958, %v243_v21  }
  0x1d   :  { %270 = vperm.xlu0 %957, %v244_v22  }
  0x1e   :  { %275 = vperm.xlu1 %958, %v245_v23  }
  0x21   :  { %280 = vperm.xlu0 %957, %v246_v24  }
  0x22   :  { %285 = vperm.xlu1 %958, %v247_v25  }
  0x25   :  { %444 = vperm.xlu0 %957, %v434_v26  }
  0x26   :  { %449 = vperm.xlu1 %958, %v435_v27  }
  0x29   :  { %454 = vperm.xlu0 %957, %v436_v28  }
  0x2a   :  { %459 = vperm.xlu1 %958, %v437_v29  }
  0x2d   :  { %464 = vperm.xlu0 %957, %v438_v30  }
  0x2e   :  { %469 = vperm.xlu1 %958, %v439_v31  }
  0x31   :  { %474 = vperm.xlu0 %957, %v440_v32  }
  0x32   :  { %479 = vperm.xlu1 %958, %v441_v33  }
  0x35   :  { %623 = vperm.xlu0 %957, %v620_v34  }
  0x83   :  { %v53_v36 = vpop.permute.xlu0 %52 }
  0x84   :  { %v63_v37 = vpop.permute.xlu1 %62 }
  0x87   :  { %v58_v38 = vpop.permute.xlu0 %57 }
  0x88   :  { %v68_v39 = vpop.permute.xlu1 %67 }
  0x8c   :  { %v73_v49 = vpop.permute.xlu0 %72 }
  0x8d   :  { %v78_v47 = vpop.permute.xlu1 %77 }
  0x90   :  { %v83_v57 = vpop.permute.xlu0 %82 }
  0x91   :  { %v88_v54 = vpop.permute.xlu1 %87 }
  0x94   :  { %v251_v18 = vpop.permute.xlu0 %250 }
  0x95   :  { %v256_v17 = vpop.permute.xlu1 %255 }
  0x98   :  { %v261_v21 = vpop.permute.xlu0 %260 }
  0x99   :  { %v266_v19 = vpop.permute.xlu1 %265 }
  0x9c   :  { %v271_v30 = vpop.permute.xlu0 %270 }
  0x9d   :  { %v276_v28 = vpop.permute.xlu1 %275 }
  0xa1   :  { %v286_v35 = vpop.permute.xlu1 %285 }
  0xd7   :  { %v823_v40 = vpop.f32.mrb[0].mxu0 }
  0xd8   :  { %v191_v41 = vadd.f32 %v823_v40, %v58_v38  ;;  %v185_v42 = vpop.f32.mrb[1].mxu0  ;;  %v281_v38 = vpop.permute.xlu0 %280 }
  0xd9   :  { %v186_v43 = vadd.f32 %v185_v42, %v53_v36 }
  0xda   :  { %959 = vtanh.f32 %v191_v41 }
  0xdb   :  { %961 = vtanh.f32 %v186_v43  ;;  %v826_v44 = vpop.f32.mrb[2].mxu0 }
  0xdc   :  { %v201_v45 = vadd.f32 %v826_v44, %v68_v39  ;;  %v195_v46 = vpop.f32.mrb[3].mxu0 }
  0xdd   :  { %v196_v48 = vadd.f32 %v195_v46, %v63_v37 }
  0xde   :  { %963 = vtanh.f32 %v201_v45 }
  0xdf   :  { %965 = vtanh.f32 %v196_v48  ;;  %v829_v50 = vpop.f32.mrb[4].mxu0 }
  0xe0   :  { %v211_v51 = vadd.f32 %v829_v50, %v78_v47  ;;  %v205_v52 = vpop.f32.mrb[5].mxu0 }
  0xe1   :  { %v206_v53 = vadd.f32 %v205_v52, %v73_v49 }
  0xe2   :  { %967 = vtanh.f32 %v211_v51 }
  0xe3   :  { %969 = vtanh.f32 %v206_v53  ;;  %v832_v55 = vpop.f32.mrb[6].mxu0  ;;  %v427_v53 = vld [vmem:[%s1292_s5 + $0x8] sm:$0xff] }
  0xe4   :  { %v960_v56 = vpop.eup %959  ;;  %v221_v58 = vadd.f32 %v832_v55, %v88_v54  ;;  %v215_v59 = vpop.f32.mrb[7].mxu0  ;;  %v428_v54 = vld [vmem:[%s1292_s5 + $0x10] sm:$0xff]  ;;  %v429_v55 = vld [vmem:[%s1292_s5 + $0x18] sm:$0xff] }
  0xe5   :  { %v962_v60 = vpop.eup %961  ;;  %v216_v61 = vadd.f32 %v215_v59, %v83_v57  ;;  %v431_v57 = vld [vmem:[%s1292_s5 + $0x28] sm:$0xff]  ;;  %v433_v59 = vld [vmem:[%s1292_s5 + $0x38] sm:$0xff] }
  0xe6   :  { %971 = vtanh.f32 %v221_v58  ;;  %v908_v62 = vpack.c.bf16 %v960_v56, %v962_v60  ;;  %v430_v56 = vld [vmem:[%s1292_s5 + $0x20] sm:$0xff]  ;;  %v432_v58 = vld [vmem:[%s1292_s5 + $0x30] sm:$0xff]  ;;  %v1038_v60 = vmov 0.0|0.0  }
  0xe7   :  { %973 = vtanh.f32 %v216_v61  ;;  %v1040_v61 = vmov 0.0  }
  0xe8   :  { %v964_v63 = vpop.eup %963  ;;  %909 = vmatprep.subr.bf16.mxu1 %v908_v62 }
  0xe9   :  { %v966_v1 = vpop.eup %965  ;;  %911 = vmatpush3.bf16.msra.mxu1 %v908_v62  ;;  %v450_v62 = vpop.permute.xlu1 %449 }
  0xea   :  { %v912_v2 = vpack.c.bf16 %v964_v63, %v966_v1  ;;  %v445_v63 = vpop.permute.xlu0 %444 }
  0xec   :  { %v968_v3 = vpop.eup %967  ;;  %913 = vmatprep.subr.bf16.mxu1 %v912_v2 }
  0xed   :  { %v970_v4 = vpop.eup %969  ;;  %915 = vmatpush3.bf16.msra.mxu1 %v912_v2  ;;  %v460_v1 = vpop.permute.xlu1 %459 }
  0xee   :  { %v916_v5 = vpack.c.bf16 %v968_v3, %v970_v4  ;;  %v455_v3 = vpop.permute.xlu0 %454 }
  0xf0   :  { %v972_v6 = vpop.eup %971  ;;  %917 = vmatprep.subr.bf16.mxu1 %v916_v5 }
  0xf1   :  { %v974_v7 = vpop.eup %973  ;;  %919 = vmatpush3.bf16.msra.mxu1 %v916_v5 }
  0xf2   :  { %v920_v8 = vpack.c.bf16 %v972_v6, %v974_v7 }
  0xf4   :  { %921 = vmatprep.subr.bf16.mxu1 %v920_v8 }
  0xf5   :  { %923 = vmatpush3.bf16.msra.mxu1 %v920_v8 }
  0xf6   :  { %940 = vmatprep.subr.bf16.mxu1 %v1038_v60 }
  0xf8   :  { %850 = vmatmul.mubr.msk.f32.vlgmr.msra.gmra.mrb[0].mxu1 %vm288_vm2, %v233_v9 }
  0xf9   :  { %852 = vmatprep.mubr.msk.f32.mxu1 %vm288_vm2, %v234_v10  ;;  %v470_v10 = vpop.permute.xlu1 %469 }
  0xfc   :  { %853 = vmatmul.mubr.msk.f32.gmra.mrb[2].mxu1 %vm288_vm2, %v235_v11 }
  0xfd   :  { %855 = vmatprep.mubr.msk.f32.mxu1 %vm288_vm2, %v236_v12  ;;  %v465_v12 = vpop.permute.xlu0 %464 }
 0x100   :  { %856 = vmatmul.mubr.msk.f32.gmra.mrb[4].mxu1 %vm288_vm2, %v237_v13 }
 0x101   :  { %858 = vmatprep.mubr.msk.f32.mxu1 %vm288_vm2, %v238_v14 }
 0x104   :  { %859 = vmatmul.mubr.msk.f32.gmra.mrb[6].mxu1 %vm288_vm2, %v239_v15 }
 0x105   :  { %905 = vmatprep.mubr.msk.f32.mxu1 %vm1039_vm3, %v1040_v61 }
 0x1cb   :  { %v851_v20 = vpop.f32.mrb[0].mxu1 }
 0x1cc   :  { %v385_v22 = vadd.f32 %v851_v20, %v256_v17  ;;  %v379_v23 = vpop.f32.mrb[1].mxu1  ;;  %v480_v17 = vpop.permute.xlu1 %479 }
 0x1cd   :  { %v380_v24 = vadd.f32 %v379_v23, %v251_v18  ;;  %v475_v20 = vpop.permute.xlu0 %474 }
 0x1ce   :  { %975 = vtanh.f32 %v385_v22 }
 0x1cf   :  { %977 = vtanh.f32 %v380_v24  ;;  %v854_v25 = vpop.f32.mrb[2].mxu1 }
 0x1d0   :  { %v395_v26 = vadd.f32 %v854_v25, %v266_v19  ;;  %v389_v27 = vpop.f32.mrb[3].mxu1 }
 0x1d1   :  { %v390_v29 = vadd.f32 %v389_v27, %v261_v21 }
 0x1d2   :  { %979 = vtanh.f32 %v395_v26 }
 0x1d3   :  { %981 = vtanh.f32 %v390_v29  ;;  %v857_v31 = vpop.f32.mrb[4].mxu1 }
 0x1d4   :  { %v405_v32 = vadd.f32 %v857_v31, %v276_v28  ;;  %v399_v33 = vpop.f32.mrb[5].mxu1 }
 0x1d5   :  { %v400_v34 = vadd.f32 %v399_v33, %v271_v30 }
 0x1d6   :  { %983 = vtanh.f32 %v405_v32 }
 0x1d7   :  { %985 = vtanh.f32 %v400_v34  ;;  %v860_v36 = vpop.f32.mrb[6].mxu1 }
 0x1d8   :  { %v976_v37 = vpop.eup %975  ;;  %v415_v39 = vadd.f32 %v860_v36, %v286_v35  ;;  %v409_v40 = vpop.f32.mrb[7].mxu1  ;;  %v619_v35 = vld [vmem:[%s1294_s7] sm:$0xf]  ;;  %v700_v36 = vsub.f32 38.75, %v1095_v0  ;;  %s1041_s7 = smov [#allocation2]  }
 0x1d9   :  { %v978_v41 = vpop.eup %977  ;;  %v410_v42 = vadd.f32 %v409_v40, %v281_v38  ;;  %s734_s30 = sshll.u32 %s1041_s7, 4  ;;  %s735_s30 = int_to_ptr.vmem [resolvable:$true] %s734_s30 }
 0x1da   :  { %987 = vtanh.f32 %v415_v39  ;;  %v924_v43 = vpack.c.bf16 %v976_v37, %v978_v41  ;;  %v768_v37 = vmul.f32 -1.442695, %v700_v36  ;;  %s1013_s10 = scalar_lea.vmem %s735_s30, 32  ;;  %p1018_p1 = scmp.lt.s32.totalorder %s735_s30, %s735_s30 }
 0x1db   :  { %989 = vtanh.f32 %v410_v42  ;;  %p1014_p0 = scmp.ne.s32.totalorder %s735_s30, %s1013_s10  ;;  %p1019_p2 = scmp.lt.s32.totalorder %s1013_s10, %s1013_s10 }
 0x1dc   :  { %v980_v44 = vpop.eup %979  ;;  %925 = vmatprep.subr.bf16.mxu0 %v924_v43 }
 0x1dd   :  { %v982_v45 = vpop.eup %981  ;;  %927 = vmatpush3.bf16.msra.mxu0 %v924_v43  ;;  %v712_v43 = vlaneseq  ;;  %p1020_p3 = por %p1019_p2, %p1018_p1 }
 0x1de   :  { %v928_v46 = vpack.c.bf16 %v980_v44, %v982_v45  ;;  %v624_v44 = vpop.permute.xlu0 %623 }
 0x1df   :  { %p1021_p4 = pnand %p1020_p3, %p1014_p0 }
 0x1e0   :  { %v984_v47 = vpop.eup %983  ;;  %929 = vmatprep.subr.bf16.mxu0 %v928_v46 }
 0x1e1   :  { %v986_v48 = vpop.eup %985  ;;  %931 = vmatpush3.bf16.msra.mxu0 %v928_v46 }
 0x1e2   :  { %v932_v49 = vpack.c.bf16 %v984_v47, %v986_v48 }
 0x1e4   :  { %v988_v50 = vpop.eup %987  ;;  %933 = vmatprep.subr.bf16.mxu0 %v932_v49 }
 0x1e5   :  { %v990_v51 = vpop.eup %989  ;;  %935 = vmatpush3.bf16.msra.mxu0 %v932_v49  ;;  %v713_v49 = vshrl.u32 %v712_v43, 7 }
 0x1e6   :  { %v936_v52 = vpack.c.bf16 %v988_v50, %v990_v51 }
 0x1e7   :  { %v714_v50 = vsub.s32 0, %v713_v49 }
 0x1e8   :  { %937 = vmatprep.subr.bf16.mxu0 %v936_v52 }
 0x1e9   :  { %939 = vmatpush3.bf16.msra.mxu0 %v936_v52 }
 0x1ec   :  { %878 = vmatmul.mubr.msk.f32.vlgmr.msra.gmra.mrb[8].mxu0 %vm288_vm2, %v427_v53 }
 0x1ed   :  { %880 = vmatprep.mubr.msk.f32.mxu0 %vm288_vm2, %v428_v54 }
 0x1f0   :  { %881 = vmatmul.mubr.msk.f32.gmra.mrb[10].mxu0 %vm288_vm2, %v429_v55 }
 0x1f1   :  { %883 = vmatprep.mubr.msk.f32.mxu0 %vm288_vm2, %v430_v56 }
 0x1f4   :  { %884 = vmatmul.mubr.msk.f32.gmra.mrb[12].mxu0 %vm288_vm2, %v431_v57 }
 0x1f5   :  { %886 = vmatprep.mubr.msk.f32.mxu0 %vm288_vm2, %v432_v58 }
 0x1f8   :  { %887 = vmatmul.mubr.msk.f32.gmra.mrb[14].mxu0 %vm288_vm2, %v433_v59 }
 0x2bf   :  { %v879_v2 = vpop.f32.mrb[8].mxu0 }
 0x2c0   :  { %v578_v4 = vadd.f32 %v879_v2, %v450_v62  ;;  %v572_v5 = vpop.f32.mrb[9].mxu0 }
 0x2c1   :  { %v573_v6 = vadd.f32 %v572_v5, %v445_v63 }
 0x2c2   :  { %991 = vtanh.f32 %v578_v4 }
 0x2c3   :  { %993 = vtanh.f32 %v573_v6  ;;  %v882_v7 = vpop.f32.mrb[10].mxu0 }
 0x2c4   :  { %v588_v8 = vadd.f32 %v882_v7, %v460_v1  ;;  %v582_v9 = vpop.f32.mrb[11].mxu0 }
 0x2c5   :  { %v583_v11 = vadd.f32 %v582_v9, %v455_v3 }
 0x2c6   :  { %995 = vtanh.f32 %v588_v8 }
 0x2c7   :  { %997 = vtanh.f32 %v583_v11  ;;  %v885_v13 = vpop.f32.mrb[12].mxu0 }
 0x2c8   :  { %v598_v14 = vadd.f32 %v885_v13, %v470_v10  ;;  %v592_v15 = vpop.f32.mrb[13].mxu0 }
 0x2c9   :  { %v593_v16 = vadd.f32 %v592_v15, %v465_v12 }
 0x2ca   :  { %999 = vtanh.f32 %v598_v14 }
 0x2cb   :  { %1001 = vtanh.f32 %v593_v16  ;;  %v888_v18 = vpop.f32.mrb[14].mxu0 }
 0x2cc   :  { %v992_v19 = vpop.eup %991  ;;  %v608_v21 = vadd.f32 %v888_v18, %v480_v17  ;;  %v602_v22 = vpop.f32.mrb[15].mxu0 }
 0x2cd   :  { %v994_v23 = vpop.eup %993  ;;  %v603_v24 = vadd.f32 %v602_v22, %v475_v20 }
 0x2ce   :  { %1003 = vtanh.f32 %v608_v21  ;;  %v941_v25 = vpack.c.bf16 %v992_v19, %v994_v23 }
 0x2cf   :  { %1005 = vtanh.f32 %v603_v24 }
 0x2d0   :  { %v996_v26 = vpop.eup %995  ;;  %942 = vmatpush3.bf16.msra.mxu1 %v941_v25  ;;  %1007 = vpow2.f32 %v768_v37 }
 0x2d1   :  { %v998_v27 = vpop.eup %997  ;;  %943 = vmatprep.subr.bf16.mxu1 %v1038_v60 }
 0x2d2   :  { %v944_v28 = vpack.c.bf16 %v996_v26, %v998_v27 }
 0x2d4   :  { %v1000_v29 = vpop.eup %999  ;;  %945 = vmatpush3.bf16.msra.mxu1 %v944_v28 }
 0x2d5   :  { %v1002_v30 = vpop.eup %1001  ;;  %946 = vmatprep.subr.bf16.mxu1 %v1038_v60 }
 0x2d6   :  { %v947_v31 = vpack.c.bf16 %v1000_v29, %v1002_v30 }
 0x2d8   :  { %v1004_v32 = vpop.eup %1003  ;;  %948 = vmatpush3.bf16.msra.mxu1 %v947_v31 }
 0x2d9   :  { %v1006_v33 = vpop.eup %1005  ;;  %949 = vmatprep.subr.bf16.mxu1 %v1038_v60 }
 0x2da   :  { %v950_v34 = vpack.c.bf16 %v1004_v32, %v1006_v33  ;;  %v1008_v38 = vpop.eup %1007 }
 0x2db   :  { %v704_v39 = vadd.f32 1.0, %v1008_v38 }
 0x2dc   :  { %951 = vmatpush3.bf16.msra.mxu1 %v950_v34 }
 0x2dd   :  { %1009 = vrcp.f32 %v704_v39 }
 0x2df   :  { %906 = vmatmul.mubr.msk.f32.vlgmr.msra.gmra.mrb[8].mxu1 %vm288_vm2, %v619_v35 }
 0x2e7   :  { %v1010_v40 = vpop.eup %1009 }
 0x2e8   :  { %v708_v41 = vrot.slane %v1010_v40, 2 }
 0x2ea   :  { %v710_v42 = vadd.f32 %v1010_v40, %v708_v41 }
 0x2ec   :  { %v711_v48 = vmul.f32 0.5, %v710_v42 }
 0x2ee   :  { %v717_v51 = vsub.f32 1.0, %v711_v48  ;;  %v715_v52 = vrot.slane %v711_v48, %v714_v50 }
 0x2f0   :  { %v721_v0 = vrot.slane %v717_v51, %v714_v50 }
 0x3b2   :  { %v695_v45 = vpop.f32.mrb[8].mxu1 }
 0x3b3   :  { %v696_v46 = vadd.f32 %v695_v45, %v624_v44  ;;  %v907_v47 = vpop.f32.mrb[9].mxu1 }
 0x3b5   :  { %1011 = vtanh.f32 %v696_v46 }
 0x3bf   :  { %v1012_v53 = vpop.eup %1011 }
 0x3c0   :  { %v716_v54 = vmul.f32 %v1012_v53, %v715_v52  ;;  %v722_v55 = vmul.f32 %v1012_v53, %v721_v0 }
 0x3c2   :  { %v724_v56 = vrot.slane %v722_v55, 2 }
 0x3c4   :  { %v726_v57 = vadd.f32 %v724_v56, %v716_v54 }
 0x3c6   :  { %727 = vst [vmem:[#allocation2] sm:$0x3] %v726_v57 }
 0x3c7   :  { %1024 = shalt.err (!%p1021_p4)
}
 0x3c8   :  { %s1025_s13 = scalar_lea.hbm %s1296_s9, 32 }
 0x3c9   :  { %p1026_p5 = scmp.ne.s32.totalorder %s1296_s9, %s1025_s13  ;;  %p1029_p6 = scmp.lt.u32.totalorder %s1025_s13, %s1296_s9 }
 0x3cb   :  { %p1031_p7 = pnand %p1029_p6, %p1026_p5 }
 0x3cd   :  { %1034 = shalt.err (!%p1031_p7)
}
 0x3ce   :  { %737 = dma.vmem_to_hbm [thread:$0]  %s735_s30, 32, %s1296_s9, [#allocation3]  }
 0x3cf   :  { %1035 = dma.done.wait [#allocation3], 32  }
 0x3d0   :  { %1036 = vsyncadd [#allocation3], 4294967264 }
 0x3d1   :  { %741 = vsyncpa [#allocation3], 1 }

</bundles_post_ra>
